<compile_context>
chip_gen: v6e
topology: v6e:2x2x1
jax: 0.10.0
libtpu: 0.0.40
codegen_flags: <defaults>
</compile_context>

<pallas_src>
import math

import jax
import jax.numpy as jnp
from jax.experimental import pallas as pl
from jax.experimental.pallas import tpu as pltpu


def _dma_copy_kernel(x_hbm, o_hbm, sem):
    # Single whole-array HBM->HBM DMA. No VMEM staging, no vld/vst, no grid.
    copy = pltpu.make_async_copy(x_hbm, o_hbm, sem)
    copy.start()
    copy.wait()


def dynamic_gcn_forward(x):
    """Pallas implementation of DynamicGCN.forward: x.view(B, C, -1).

    The reshape itself is metadata-only (row-major contiguous, identical to
    torch .view) and is done in the wrapper; the kernel is one HBM->HBM DMA.
    """
    B, C = x.shape[0], x.shape[1]
    flat = math.prod(x.shape[2:])
    n = B * C * flat
    itemsize = jnp.dtype(x.dtype).itemsize

    # Metadata-only flatten of the trailing dims (matches torch .view).
    x3 = jnp.reshape(x, (B, C, flat))

    return pl.pallas_call(
        _dma_copy_kernel,
        out_shape=jax.ShapeDtypeStruct((B, C, flat), x.dtype),
        in_specs=[pl.BlockSpec(memory_space=pl.ANY)],
        out_specs=pl.BlockSpec(memory_space=pl.ANY),
        scratch_shapes=[pltpu.SemaphoreType.DMA(())],
        cost_estimate=pl.CostEstimate(
            flops=0, transcendentals=0, bytes_accessed=2 * n * itemsize),
    )(x3)


if __name__ == "__main__":
    key = jax.random.PRNGKey(0)

    # Shape consistent with the module defaults: in_ch=2, n_joints=17, seq=8
    # (flat = 136, i.e. NOT a multiple of 128 — the DMA path doesn't care).
    B, C, T, J = 2, 2, 8, 17
    x = jax.random.normal(key, (B, C, T, J), dtype=jnp.float32)
    out = jax.block_until_ready(dynamic_gcn_forward(x))
    ref = jnp.reshape(x, (B, C, T * J))
    assert out.shape == (B, C, T * J), out.shape
    assert jnp.array_equal(out, ref), "mismatch vs reference reshape (136-wide)"

    # A lane-dense shape as well (flat = 256).
    B2, C2, T2, J2 = 2, 4, 16, 16
    x2 = jax.random.normal(jax.random.PRNGKey(0), (B2, C2, T2, J2),
                           dtype=jnp.float32)
    out2 = jax.block_until_ready(dynamic_gcn_forward(x2))
    ref2 = jnp.reshape(x2, (B2, C2, T2 * J2))
    assert out2.shape == (B2, C2, T2 * J2), out2.shape
    assert jnp.array_equal(out2, ref2), "mismatch vs reference reshape (256-wide)"

    print("KERNEL_OK")
</pallas_src>

<mosaic_0001>
module attributes {stable_mosaic.version = 11 : i64} {
  func.func @_dma_copy_kernel(%arg0: memref<2x2x136xf32, #tpu.memory_space<any>>, %arg1: memref<2x2x136xf32, #tpu.memory_space<any>>, %arg2: memref<!tpu.dma_semaphore, #tpu.memory_space<semaphore_mem>>) attributes {dimension_semantics = [], scalar_prefetch = 0 : i64, scratch_operands = 1 : i64, tpu.core_type = #tpu.core_type<tc>} {
    tpu.enqueue_dma source(%arg0 : memref<2x2x136xf32, #tpu.memory_space<any>>) target(%arg1 : memref<2x2x136xf32, #tpu.memory_space<any>>) target_semaphore(%arg2 : memref<!tpu.dma_semaphore, #tpu.memory_space<semaphore_mem>>)
    tpu.wait_dma2 semaphore(%arg2 : memref<!tpu.dma_semaphore, #tpu.memory_space<semaphore_mem>>) src(%arg0 : memref<2x2x136xf32, #tpu.memory_space<any>>) dst(%arg1 : memref<2x2x136xf32, #tpu.memory_space<any>>)
    return
  }
}

</mosaic_0001>

<bundles_post_ra>
// kernel: tpu_custom_call.1
= control target key start
LH: loop header
LB: loop body
LE: loop exit
PB: predicated region body
PF: predicated region fallthrough
CT: control target
= control target key end

     0   :  { %s30_s6 = smov [#allocation2]   ;;  %s31_s7 = smov 131072   ;;  %s49_s0 = inlined_call_operand.hbm [shape: f32[2,2,136], index: 0, kind: input, shape index: {}]   ;;  %s50_s1 = inlined_call_operand.hbm [shape: f32[2,2,136], index: 1, kind: output, shape index: {}]  }
   0x1   :  { %s32_s8 = smov 0  }
   0x2   :  { %12 = dma.general %s49_s0, 128, %s50_s1, %s30_s6, %s31_s7, [#allocation4], %s32_s8, 0  }
   0x3   :  { %28 = dma.done.wait [#allocation2], 128 }
   0x4   :  { %29 = vsyncadd [#allocation2], 4294967168 }
   0x5   :  { %18 = vsyncmov [#allocation2] }
   0x8   :  { %s19_s13 = vpop.sfrf %18 }
   0x9   :  { %p24_p0 = scmp.ne.s32.totalorder %s19_s13, 0 }
   0xb   :  { %23 = shalt.err (%p24_p0)  }

</bundles_post_ra>
